<compile_context>
chip_gen: v5e
topology: v5e:2x2
jax: 0.10.0
libtpu: 0.0.40
codegen_flags: <defaults>
</compile_context>

<pallas_src>
import functools

import jax
import jax.numpy as jnp
from jax.experimental import pallas as pl
from jax.experimental.pallas import tpu as pltpu

LANE = 128
SUBLANE = 8


def _round_up(x, m):
    return (x + m - 1) // m * m


def similarity_kernel(lT_ref, rT_ref, w1T_ref, w2T_ref, bh_ref, wpT_ref, bp_ref,
                      out_ref):
    # Transposed layout: feature dims on sublanes, batch on lanes.
    l = lT_ref[...]                       # (mem_dim, tb) bf16
    r = rT_ref[...]

    mult_dist = l * r                     # VPU elementwise
    abs_dist = jnp.abs(l - r)

    # cat([mult, abs]) @ Wh  ==  W1^T @ mult + W2^T @ abs  (split matmul, no concat)
    # bf16 MXU operands, f32 accumulation.
    h = (jnp.dot(w1T_ref[...], mult_dist, preferred_element_type=jnp.float32)
         + jnp.dot(w2T_ref[...], abs_dist, preferred_element_type=jnp.float32)
         + bh_ref[...])                   # (hidden_p, tb) f32, bias bcast over lanes

    # sigmoid(h) == 0.5*(tanh(h/2)+1): single EUP push per element, f32 math.
    h = 0.5 * (jnp.tanh(0.5 * h) + 1.0)

    logits = (jnp.dot(wpT_ref[...], h.astype(jnp.bfloat16),
                      preferred_element_type=jnp.float32)
              + bp_ref[...])              # (classes_p, tb); padded classes bias -1e30

    # log_softmax over classes = cheap sublane (axis-0) reduction over <=8 rows.
    m = jnp.max(logits, axis=0, keepdims=True)
    shifted = logits - m
    lse = jnp.log(jnp.sum(jnp.exp(shifted), axis=0, keepdims=True))
    out_ref[...] = shifted - lse


def prepare_similarity_params(wh_w, wh_b, wp_w, wp_b):
    """Pad / transpose Linear parameters ONCE (hoisted out of the per-call path).

    wh_w: (2*mem_dim, hidden), wh_b: (hidden,), wp_w: (hidden, classes),
    wp_b: (classes,)  -- stored transposed vs. PyTorch, i.e. y = x @ W + b.
    """
    two_mem, hidden_dim = wh_w.shape
    mem_dim = two_mem // 2
    num_classes = wp_w.shape[1]

    hidden_p = _round_up(hidden_dim, SUBLANE)
    classes_p = _round_up(num_classes, SUBLANE)

    wh_w = wh_w.astype(jnp.float32)
    wp_w = wp_w.astype(jnp.float32)

    # Transposed halves of Wh with zero-padded hidden rows.  Padded hidden units
    # give sigmoid(0)=0.5, but the matching wpT columns are zero -> no effect.
    w1T = (jnp.zeros((hidden_p, mem_dim), jnp.float32)
           .at[:hidden_dim, :].set(wh_w[:mem_dim, :].T)).astype(jnp.bfloat16)
    w2T = (jnp.zeros((hidden_p, mem_dim), jnp.float32)
           .at[:hidden_dim, :].set(wh_w[mem_dim:, :].T)).astype(jnp.bfloat16)
    bh = (jnp.zeros((hidden_p, 1), jnp.float32)
          .at[:hidden_dim, 0].set(wh_b.astype(jnp.float32)))

    wpT = (jnp.zeros((classes_p, hidden_p), jnp.float32)
           .at[:num_classes, :hidden_dim].set(wp_w.T)).astype(jnp.bfloat16)
    # Padded classes get -1e30 bias (kept in f32) -> exp == 0 under log_softmax.
    bp = (jnp.full((classes_p, 1), -1e30, jnp.float32)
          .at[:num_classes, 0].set(wp_b.astype(jnp.float32)))

    return (w1T, w2T, bh, wpT, bp), num_classes


@functools.partial(jax.jit, static_argnames=("num_classes", "block_b"))
def similarity_forward(lvec, rvec, w1T, w2T, bh, wpT, bp, *,
                       num_classes, block_b=4096):
    """lvec, rvec: (B, mem_dim). Returns (B, num_classes) log-probs (f32)."""
    B, mem_dim = lvec.shape
    hidden_p = w1T.shape[0]
    classes_p = wpT.shape[0]

    # --- batch tiling: batch lives on the lane axis -> tb multiple of 128 ------
    b_pad = _round_up(B, LANE)
    tb = min(_round_up(block_b, LANE), b_pad)
    # Keep >= 2 tiles when the batch allows it so the "parallel" grid axis can
    # actually span both TensorCores on v7x.
    if b_pad // tb < 2 and b_pad >= 2 * LANE:
        tb = _round_up(b_pad // 2, LANE)
    B_p = _round_up(B, tb)

    # Ship inputs transposed + bf16: halves input DMA bytes and makes the
    # classes-on-sublanes output layout transpose-free inside the kernel.
    lT = jnp.asarray(lvec, jnp.bfloat16).T
    rT = jnp.asarray(rvec, jnp.bfloat16).T
    if B_p != B:
        pad = ((0, 0), (0, B_p - B))
        lT = jnp.pad(lT, pad)
        rT = jnp.pad(rT, pad)

    grid = (B_p // tb,)

    cost = pl.CostEstimate(
        flops=2 * B_p * (2 * mem_dim * hidden_p + hidden_p * classes_p),
        transcendentals=B_p * (hidden_p + classes_p),
        bytes_accessed=(2 * B_p * mem_dim * 2          # lT, rT (bf16)
                        + B_p * classes_p * 4          # out (f32)
                        + 2 * hidden_p * mem_dim * 2   # w1T, w2T (bf16)
                        + classes_p * hidden_p * 2     # wpT (bf16)
                        + (hidden_p + classes_p) * 4),  # biases (f32)
    )

    out_t = pl.pallas_call(
        similarity_kernel,
        out_shape=jax.ShapeDtypeStruct((classes_p, B_p), jnp.float32),
        grid_spec=pltpu.PrefetchScalarGridSpec(
            num_scalar_prefetch=0,
            grid=grid,
            in_specs=[
                # batch tiles: streamed / pipelined over the grid
                pl.BlockSpec((mem_dim, tb), lambda i: (0, i)),          # lT
                pl.BlockSpec((mem_dim, tb), lambda i: (0, i)),          # rT
                # weights / biases: VMEM-resident across all grid steps
                pl.BlockSpec((hidden_p, mem_dim), lambda i: (0, 0)),    # w1T
                pl.BlockSpec((hidden_p, mem_dim), lambda i: (0, 0)),    # w2T
                pl.BlockSpec((hidden_p, 1), lambda i: (0, 0)),          # bh
                pl.BlockSpec((classes_p, hidden_p), lambda i: (0, 0)),  # wpT
                pl.BlockSpec((classes_p, 1), lambda i: (0, 0)),         # bp
            ],
            out_specs=pl.BlockSpec((classes_p, tb), lambda i: (0, i)),
        ),
        compiler_params=pltpu.CompilerParams(
            dimension_semantics=("parallel",)),   # shard batch tiles on v7x 2-TC
        cost_estimate=cost,
    )(lT, rT, w1T, w2T, bh, wpT, bp)

    # Back to (B, num_classes); tiny transpose + slice in the wrapper.
    return out_t[:num_classes, :B].T


def similarity_reference(lvec, rvec, wh_w, wh_b, wp_w, wp_b):
    """Pure-JAX f32 reference mirroring the PyTorch forward."""
    mult_dist = lvec * rvec
    abs_dist = jnp.abs(lvec - rvec)
    vec_dist = jnp.concatenate([mult_dist, abs_dist], axis=1)
    out = jax.nn.sigmoid(vec_dist @ wh_w + wh_b)
    logits = out @ wp_w + wp_b
    return jax.nn.log_softmax(logits, axis=1)


if __name__ == "__main__":
    mem_dim = 32
    hidden_dim = 32
    num_classes = 5

    key = jax.random.PRNGKey(0)
    k1, k2, k3, k4, k5, k6 = jax.random.split(key, 6)

    # Deterministic parameters (shapes per nn.Linear; stored transposed).
    wh_w = jax.random.normal(k3, (2 * mem_dim, hidden_dim), dtype=jnp.float32) * 0.1
    wh_b = jax.random.normal(k4, (hidden_dim,), dtype=jnp.float32) * 0.1
    wp_w = jax.random.normal(k5, (hidden_dim, num_classes), dtype=jnp.float32) * 0.1
    wp_b = jax.random.normal(k6, (num_classes,), dtype=jnp.float32) * 0.1

    params, n_cls = prepare_similarity_params(wh_w, wh_b, wp_w, wp_b)

    # Small batch (single tile).
    B = 8
    lvec = jax.random.normal(k1, (B, mem_dim), dtype=jnp.float32)
    rvec = jax.random.normal(k2, (B, mem_dim), dtype=jnp.float32)
    out = similarity_forward(lvec, rvec, *params, num_classes=n_cls)
    jax.block_until_ready(out)
    ref = similarity_reference(lvec, rvec, wh_w, wh_b, wp_w, wp_b)
    assert out.shape == (B, num_classes)
    # bf16 MXU operands / bf16 input DMA -> relaxed tolerance vs f32 reference.
    assert jnp.allclose(out, ref, atol=2e-2, rtol=2e-2), \
        float(jnp.max(jnp.abs(out - ref)))

    # Larger batch with a small forced tile: exercises padding + multi-tile grid.
    B2 = 300
    l2 = jax.random.normal(k1, (B2, mem_dim), dtype=jnp.float32)
    r2 = jax.random.normal(k2, (B2, mem_dim), dtype=jnp.float32)
    out2 = similarity_forward(l2, r2, *params, num_classes=n_cls, block_b=128)
    jax.block_until_ready(out2)
    ref2 = similarity_reference(l2, r2, wh_w, wh_b, wp_w, wp_b)
    assert out2.shape == (B2, num_classes)
    assert jnp.allclose(out2, ref2, atol=2e-2, rtol=2e-2), \
        float(jnp.max(jnp.abs(out2 - ref2)))

    print("KERNEL_OK")
</pallas_src>

<mosaic_0001>
module attributes {stable_mosaic.version = 11 : i64} {
  func.func @similarity_kernel(%arg0: i32, %arg1: memref<32x128xbf16, #tpu.memory_space<vmem>>, %arg2: memref<32x128xbf16, #tpu.memory_space<vmem>>, %arg3: memref<32x32xbf16, #tpu.memory_space<vmem>>, %arg4: memref<32x32xbf16, #tpu.memory_space<vmem>>, %arg5: memref<32x1xf32, #tpu.memory_space<vmem>>, %arg6: memref<8x32xbf16, #tpu.memory_space<vmem>>, %arg7: memref<8x1xf32, #tpu.memory_space<vmem>>, %arg8: memref<8x128xf32, #tpu.memory_space<vmem>>) attributes {dimension_semantics = [#tpu.dimension_semantics<parallel>], iteration_bounds = array<i64: 1>, scalar_prefetch = 0 : i64, scratch_operands = 0 : i64, tpu.core_type = #tpu.core_type<tc>, window_params = [{transform_indices = @transform_0, window_bounds = array<i64: 32, 128>}, {transform_indices = @transform_1, window_bounds = array<i64: 32, 128>}, {pipeline_mode = #tpu.pipeline_mode<synchronous>, transform_indices = @transform_2, window_bounds = array<i64: 32, 32>}, {pipeline_mode = #tpu.pipeline_mode<synchronous>, transform_indices = @transform_3, window_bounds = array<i64: 32, 32>}, {pipeline_mode = #tpu.pipeline_mode<synchronous>, transform_indices = @transform_4, window_bounds = array<i64: 32, 1>}, {pipeline_mode = #tpu.pipeline_mode<synchronous>, transform_indices = @transform_5, window_bounds = array<i64: 8, 32>}, {pipeline_mode = #tpu.pipeline_mode<synchronous>, transform_indices = @transform_6, window_bounds = array<i64: 8, 1>}, {transform_indices = @transform_7, window_bounds = array<i64: 8, 128>}]} {
    %c0 = arith.constant 0 : index
    %c0_0 = arith.constant 0 : index
    %0 = vector.load %arg1[%c0, %c0_0] : memref<32x128xbf16, #tpu.memory_space<vmem>>, vector<32x128xbf16>
    %c0_1 = arith.constant 0 : index
    %c0_2 = arith.constant 0 : index
    %1 = vector.load %arg2[%c0_1, %c0_2] : memref<32x128xbf16, #tpu.memory_space<vmem>>, vector<32x128xbf16>
    %2 = arith.mulf %0, %1 : vector<32x128xbf16>
    %3 = arith.subf %0, %1 : vector<32x128xbf16>
    %4 = math.absf %3 : vector<32x128xbf16>
    %c0_3 = arith.constant 0 : index
    %c0_4 = arith.constant 0 : index
    %5 = vector.load %arg3[%c0_3, %c0_4] : memref<32x32xbf16, #tpu.memory_space<vmem>>, vector<32x32xbf16>
    %cst = arith.constant dense<0.000000e+00> : vector<32x128xf32>
    %6 = tpu.matmul %5, %2, %cst {dimension_numbers = #tpu.dot_dimension_numbers<[1], [0], [0], [1], [0, 0, 1, 1], [], []>} : vector<32x32xbf16>, vector<32x128xbf16>, vector<32x128xf32> -> vector<32x128xf32>
    %c0_5 = arith.constant 0 : index
    %c0_6 = arith.constant 0 : index
    %7 = vector.load %arg4[%c0_5, %c0_6] : memref<32x32xbf16, #tpu.memory_space<vmem>>, vector<32x32xbf16>
    %cst_7 = arith.constant dense<0.000000e+00> : vector<32x128xf32>
    %8 = tpu.matmul %7, %4, %cst_7 {dimension_numbers = #tpu.dot_dimension_numbers<[1], [0], [0], [1], [0, 0, 1, 1], [], []>} : vector<32x32xbf16>, vector<32x128xbf16>, vector<32x128xf32> -> vector<32x128xf32>
    %9 = arith.addf %6, %8 : vector<32x128xf32>
    %c0_8 = arith.constant 0 : index
    %c0_9 = arith.constant 0 : index
    %10 = vector.load %arg5[%c0_8, %c0_9] : memref<32x1xf32, #tpu.memory_space<vmem>>, vector<32x1xf32>
    %11 = vector.broadcast %10 : vector<32x1xf32> to vector<32x128xf32>
    %12 = arith.addf %9, %11 : vector<32x128xf32>
    %cst_10 = arith.constant 5.000000e-01 : f32
    %13 = vector.broadcast %cst_10 : f32 to vector<32x128xf32>
    %14 = arith.mulf %13, %12 : vector<32x128xf32>
    %15 = math.tanh %14 : vector<32x128xf32>
    %cst_11 = arith.constant 1.000000e+00 : f32
    %16 = vector.broadcast %cst_11 : f32 to vector<32x128xf32>
    %17 = arith.addf %15, %16 : vector<32x128xf32>
    %cst_12 = arith.constant 5.000000e-01 : f32
    %18 = vector.broadcast %cst_12 : f32 to vector<32x128xf32>
    %19 = arith.mulf %18, %17 : vector<32x128xf32>
    %c0_13 = arith.constant 0 : index
    %c0_14 = arith.constant 0 : index
    %20 = vector.load %arg6[%c0_13, %c0_14] : memref<8x32xbf16, #tpu.memory_space<vmem>>, vector<8x32xbf16>
    %21 = arith.truncf %19 : vector<32x128xf32> to vector<32x128xbf16>
    %cst_15 = arith.constant dense<0.000000e+00> : vector<8x128xf32>
    %22 = tpu.matmul %20, %21, %cst_15 {dimension_numbers = #tpu.dot_dimension_numbers<[1], [0], [0], [1], [0, 0, 1, 1], [], []>} : vector<8x32xbf16>, vector<32x128xbf16>, vector<8x128xf32> -> vector<8x128xf32>
    %c0_16 = arith.constant 0 : index
    %c0_17 = arith.constant 0 : index
    %23 = vector.load %arg7[%c0_16, %c0_17] : memref<8x1xf32, #tpu.memory_space<vmem>>, vector<8x1xf32>
    %24 = vector.broadcast %23 : vector<8x1xf32> to vector<8x128xf32>
    %25 = arith.addf %22, %24 : vector<8x128xf32>
    %cst_18 = arith.constant dense<0xFF800000> : vector<128xf32>
    %26 = vector.multi_reduction <maximumf>, %25, %cst_18 [0] : vector<8x128xf32> to vector<128xf32>
    %27 = vector.shape_cast %26 : vector<128xf32> to vector<1x128xf32>
    %28 = vector.broadcast %27 : vector<1x128xf32> to vector<8x128xf32>
    %29 = arith.subf %25, %28 : vector<8x128xf32>
    %30 = math.exp %29 : vector<8x128xf32>
    %cst_19 = arith.constant dense<0.000000e+00> : vector<128xf32>
    %31 = vector.multi_reduction <add>, %30, %cst_19 [0] : vector<8x128xf32> to vector<128xf32>
    %32 = vector.shape_cast %31 : vector<128xf32> to vector<1x128xf32>
    %33 = math.log %32 : vector<1x128xf32>
    %34 = vector.broadcast %33 : vector<1x128xf32> to vector<8x128xf32>
    %35 = arith.subf %29, %34 : vector<8x128xf32>
    %c0_20 = arith.constant 0 : index
    %c0_21 = arith.constant 0 : index
    %36 = vector.load %arg8[%c0_20, %c0_21] : memref<8x128xf32, #tpu.memory_space<vmem>>, vector<8x128xf32>
    tpu.vector_store %arg8[%c0_20, %c0_21], %35 {strides = array<i32>} : memref<8x128xf32, #tpu.memory_space<vmem>>, vector<8x128xf32>,
    return
  }
  func.func @transform_0(%arg0: i32) -> (i32, i32) {
    %c0_i32 = arith.constant 0 : i32
    %c0_i32_0 = arith.constant 0 : i32
    return %c0_i32, %arg0 : i32, i32
  }
  func.func @transform_1(%arg0: i32) -> (i32, i32) {
    %c0_i32 = arith.constant 0 : i32
    %c0_i32_0 = arith.constant 0 : i32
    return %c0_i32, %arg0 : i32, i32
  }
  func.func @transform_2(%arg0: i32) -> (i32, i32) {
    %c0_i32 = arith.constant 0 : i32
    %c0_i32_0 = arith.constant 0 : i32
    %c0_i32_1 = arith.constant 0 : i32
    return %c0_i32, %c0_i32_0 : i32, i32
  }
  func.func @transform_3(%arg0: i32) -> (i32, i32) {
    %c0_i32 = arith.constant 0 : i32
    %c0_i32_0 = arith.constant 0 : i32
    %c0_i32_1 = arith.constant 0 : i32
    return %c0_i32, %c0_i32_0 : i32, i32
  }
  func.func @transform_4(%arg0: i32) -> (i32, i32) {
    %c0_i32 = arith.constant 0 : i32
    %c0_i32_0 = arith.constant 0 : i32
    %c0_i32_1 = arith.constant 0 : i32
    return %c0_i32, %c0_i32_0 : i32, i32
  }
  func.func @transform_5(%arg0: i32) -> (i32, i32) {
    %c0_i32 = arith.constant 0 : i32
    %c0_i32_0 = arith.constant 0 : i32
    %c0_i32_1 = arith.constant 0 : i32
    return %c0_i32, %c0_i32_0 : i32, i32
  }
  func.func @transform_6(%arg0: i32) -> (i32, i32) {
    %c0_i32 = arith.constant 0 : i32
    %c0_i32_0 = arith.constant 0 : i32
    %c0_i32_1 = arith.constant 0 : i32
    return %c0_i32, %c0_i32_0 : i32, i32
  }
  func.func @transform_7(%arg0: i32) -> (i32, i32) {
    %c0_i32 = arith.constant 0 : i32
    %c0_i32_0 = arith.constant 0 : i32
    return %c0_i32, %arg0 : i32, i32
  }
}

</mosaic_0001>

<bundles_post_ra>
// kernel: similarity_forward.1
= control target key start
LH: loop header
LB: loop body
LE: loop exit
PB: predicated region body
PF: predicated region fallthrough
CT: control target
= control target key end

     0   :  { %v289_v3 = vmov 0   ;;  %vm75_vm0 = vcmask 261120   ;;  %s380_s0 = inlined_call_operand.vmem [shape: bf16[32,128], index: 0, kind: input, shape index: {}]   ;;  %s381_s1 = inlined_call_operand.vmem [shape: bf16[32,128], index: 1, kind: input, shape index: {}]   ;;  %s382_s4 = inlined_call_operand.vmem [shape: f32[32,1], index: 4, kind: input, shape index: {}]   ;;  %s383_s2 = inlined_call_operand.vmem [shape: bf16[32,32], index: 2, kind: input, shape index: {}]   ;;  %s384_s3 = inlined_call_operand.vmem [shape: bf16[32,32], index: 3, kind: input, shape index: {}]   ;;  %s385_s6 = inlined_call_operand.vmem [shape: f32[8,1], index: 6, kind: input, shape index: {}]   ;;  %s386_s5 = inlined_call_operand.vmem [shape: bf16[8,32], index: 5, kind: input, shape index: {}]   ;;  %s387_s7 = inlined_call_operand.vmem [shape: f32[8,128], index: 7, kind: output, shape index: {}]  }
   0x1   :  { %v269_v0 = vld [vmem:[%s380_s0 + $0x8] sm:$0xff]   ;;  %v254_v2 = vld [vmem:[%s380_s0] sm:$0xff]   ;;  %275 = vset.pattern.permute.xlu1 %v289_v3  ;;  %274 = vset.pattern.permute.xlu0 %v289_v3  ;;  %v138_v18 = vld [vmem:[%s382_s4 + $0x10] sm:$0xff] }
   0x2   :  { %v270_v1 = vld [vmem:[%s381_s1 + $0x8] sm:$0xff]   ;;  %v259_v4 = vunpack.c.l.bf16 %v269_v0  ;;  %v260_v5 = vunpack.c.h.bf16 %v269_v0  ;;  %v262_v8 = vld [vmem:[%s381_s1] sm:$0xff]   ;;  %276 = vset.pattern.permute.xlu2 %v289_v3  ;;  %v255_v9 = vunpack.c.l.bf16 %v254_v2  ;;  %v256_v10 = vunpack.c.h.bf16 %v254_v2  ;;  %152 = vperm.xlu0 %274, %v138_v18   ;;  %v139_v30 = vld [vmem:[%s382_s4 + $0x18] sm:$0xff] }
   0x3   :  { %v267_v6 = vunpack.c.l.bf16 %v270_v1  ;;  %v268_v7 = vunpack.c.h.bf16 %v270_v1  ;;  %v263_v11 = vunpack.c.l.bf16 %v262_v8  ;;  %v264_v12 = vunpack.c.h.bf16 %v262_v8  ;;  %v136_v13 = vld [vmem:[%s382_s4] sm:$0xff]  ;;  %v137_v28 = vld [vmem:[%s382_s4 + $0x8] sm:$0xff] }
   0x4   :  { %142 = vperm.xlu1 %275, %v136_v13   ;;  %v249_v31 = vld [vmem:[%s383_s2] sm:$0xff]  ;;  %v252_v33 = vld [vmem:[%s384_s3 + $0x8] sm:$0xff] }
   0x5   :  { %v45_v14 = vmul.f32 %v267_v6, %v259_v4  ;;  %v46_v15 = vmul.f32 %v268_v7, %v260_v5  ;;  %v51_v16 = vsub.f32 %v259_v4, %v267_v6  ;;  %v52_v17 = vsub.f32 %v260_v5, %v268_v7  ;;  %v251_v32 = vld [vmem:[%s384_s3] sm:$0xff]  ;;  %v250_v34 = vld [vmem:[%s383_s2 + $0x8] sm:$0xff] }
   0x6   :  { %v43_v19 = vmul.f32 %v263_v11, %v255_v9  ;;  %v44_v20 = vmul.f32 %v264_v12, %v256_v10  ;;  %v49_v21 = vsub.f32 %v255_v9, %v263_v11  ;;  %v50_v22 = vsub.f32 %v256_v10, %v264_v12  ;;  %v183_v48 = vld [vmem:[%s385_s6] sm:$0xff] }
   0x7   :  { %v48_v23 = vpack.c.bf16 %v46_v15, %v45_v14  ;;  %v54_v24 = vpack.c.bf16 %v52_v17, %v51_v16  ;;  %186 = vperm.xlu2 %276, %v183_v48   ;;  %v180_v10 = vld [vmem:[%s386_s5] sm:$0xf] }
   0x8   :  { %v53_v25 = vpack.c.bf16 %v50_v22, %v49_v21  ;;  %v47_v27 = vpack.c.bf16 %v44_v20, %v43_v19 }
   0x9   :  { %123 = vmatpush.bf16.msra.mxu1 %v48_v23  ;;  %v56_v26 = vand.u32 2147450879, %v54_v24 }
   0xa   :  { %v55_v29 = vand.u32 2147450879, %v53_v25  ;;  %157 = vperm.xlu0 %274, %v139_v30  }
   0xb   :  { %88 = vmatpush.bf16.msra.mxu0 %v56_v26  ;;  %271 = vmatpush.bf16.msra.mxu3 %v56_v26 }
   0xc   :  { %147 = vperm.xlu1 %275, %v137_v28  }
   0xd   :  { %124 = vmatpush.bf16.msra.mxu1 %v47_v27 }
   0xf   :  { %89 = vmatpush.bf16.msra.mxu0 %v55_v29  ;;  %272 = vmatpush.bf16.msra.mxu3 %v55_v29 }
  0x10   :  { %246 = vmatmul.msk.bf16.vlgmr.msra.gmra.mxu1 %vm75_vm0, %v249_v31 }
  0x12   :  { %236 = vmatmul.msk.bf16.vlgmr.msra.gmra.mxu0 %vm75_vm0, %v251_v32  ;;  %237 = vmatmul.msk.bf16.vlgmr.msra.gmra.mxu3 %vm75_vm0, %v252_v33 }
  0x20   :  { %247 = vmatmul.msk.bf16.gmra.mxu1 %vm75_vm0, %v250_v34 }
  0x61   :  { %v187_v11 = vpop.permute.xlu2 %186 }
  0x74   :  { %v153_v41 = vpop.permute.xlu0 %152 }
  0x76   :  { %v143_v37 = vpop.permute.xlu1 %142 }
  0x7c   :  { %v158_v57 = vpop.permute.xlu0 %157 }
  0x7e   :  { %v148_v46 = vpop.permute.xlu1 %147 }
  0x8d   :  { %v126_v35 = vpop.f32.mrf.mxu1 }
  0x8f   :  { %v91_v36 = vpop.f32.mrf.mxu0 }
  0x90   :  { %v127_v45 = vadd.f32 %v126_v35, %v91_v36 }
  0x92   :  { %v160_v50 = vadd.f32 %v143_v37, %v127_v45 }
  0x94   :  { %v164_v56 = vmul.f32 0.5, %v160_v50 }
  0x95   :  { %v128_v38 = vpop.f32.mrf.mxu1  ;;  %v96_v39 = vpop.f32.mrf.mxu3 }
  0x97   :  { %v93_v40 = vpop.f32.mrf.mxu0 }
  0x98   :  { %v129_v43 = vadd.f32 %v128_v38, %v93_v40 }
  0x9a   :  { %v161_v49 = vadd.f32 %v148_v46, %v129_v43 }
  0x9c   :  { %v165_v54 = vmul.f32 0.5, %v161_v49 }
  0x9d   :  { %v131_v42 = vpop.f32.mrf.mxu1  ;;  %v98_v52 = vpop.f32.mrf.mxu3 }
  0x9e   :  { %v132_v44 = vadd.f32 %v131_v42, %v96_v39 }
  0xa0   :  { %v162_v47 = vadd.f32 %v153_v41, %v132_v44 }
  0xa2   :  { %v166_v51 = vmul.f32 0.5, %v162_v47 }
  0xa4   :  { %277 = vtanh.f32 %v166_v51 }
  0xa5   :  { %v133_v53 = vpop.f32.mrf.mxu1  ;;  %279 = vtanh.f32 %v165_v54 }
  0xa6   :  { %v134_v55 = vadd.f32 %v133_v53, %v98_v52  ;;  %281 = vtanh.f32 %v164_v56 }
  0xa8   :  { %v163_v58 = vadd.f32 %v158_v57, %v134_v55 }
  0xaa   :  { %v167_v59 = vmul.f32 0.5, %v163_v58  ;;  %v278_v60 = vpop.eup %277 }
  0xab   :  { %v280_v61 = vpop.eup %279  ;;  %v174_v63 = vadd.f32 1.0, %v278_v60 }
  0xac   :  { %283 = vtanh.f32 %v167_v59  ;;  %v282_v62 = vpop.eup %281  ;;  %v173_v1 = vadd.f32 1.0, %v280_v61 }
  0xad   :  { %v172_v3 = vadd.f32 1.0, %v282_v62  ;;  %v178_v4 = vmul.f32 0.5, %v174_v63 }
  0xae   :  { %v177_v7 = vmul.f32 0.5, %v173_v1 }
  0xaf   :  { %v176_v8 = vmul.f32 0.5, %v172_v3 }
  0xb1   :  { %v181_v9 = vpack.c.bf16 %v177_v7, %v176_v8 }
  0xb2   :  { %v284_v0 = vpop.eup %283 }
  0xb3   :  { %v175_v2 = vadd.f32 1.0, %v284_v0 }
  0xb5   :  { %v179_v5 = vmul.f32 0.5, %v175_v2 }
  0xb7   :  { %v182_v6 = vpack.c.bf16 %v179_v5, %v178_v4 }
  0xb9   :  { %198 = vmatpush.bf16.msra.mxu2 %v182_v6 }
  0xbd   :  { %199 = vmatpush.bf16.msra.mxu2 %v181_v9 }
  0xc0   :  { %248 = vmatmul.msk.bf16.vlgmr.msra.gmra.mxu2 %vm75_vm0, %v180_v10 }
 0x143   :  { %v201_v12 = vpop.f32.mrf.mxu2 }
 0x144   :  { %v202_v13 = vadd.f32 %v201_v12, %v187_v11 }
 0x146   :  { %v205_v14 = vrot.slane %v202_v13, 4 }
 0x148   :  { %v206_v15 = vmax.f32 %v202_v13, %v205_v14 }
 0x14a   :  { %v207_v16 = vrot.slane %v206_v15, 2 }
 0x14b   :  { %v203_v17 = vpop.f32.mrf.mxu2 }
 0x14c   :  { %v208_v18 = vmax.f32 %v206_v15, %v207_v16 }
 0x14e   :  { %v209_v19 = vrot.slane %v208_v18, 1 }
 0x150   :  { %v210_v20 = vmax.f32 %v208_v18, %v209_v19 }
 0x152   :  { %v211_v21 = vsub.f32 %v202_v13, %v210_v20 }
 0x154   :  { %v212_v22 = vmul.f32 1.442695, %v211_v21 }
 0x156   :  { %285 = vpow2.f32 %v212_v22 }
 0x15c   :  { %v286_v23 = vpop.eup %285 }
 0x15d   :  { %v214_v24 = vrot.slane %v286_v23, 4 }
 0x15f   :  { %v215_v25 = vadd.f32 %v286_v23, %v214_v24 }
 0x161   :  { %v216_v26 = vrot.slane %v215_v25, 2 }
 0x163   :  { %v217_v27 = vadd.f32 %v216_v26, %v215_v25 }
 0x165   :  { %v218_v28 = vrot.slane %v217_v27, 1 }
 0x167   :  { %v219_v29 = vadd.f32 %v218_v28, %v217_v27 }
 0x169   :  { %287 = vlog2.f32 %v219_v29 }
 0x16f   :  { %v288_v30 = vpop.eup %287 }
 0x170   :  { %v221_v31 = vmul.f32 0.6931472, %v288_v30 }
 0x172   :  { %v222_v32 = vsub.f32 %v211_v21, %v221_v31 }
 0x174   :  { %223 = vst [vmem:[%s387_s7] sm:$0xff] %v222_v32 }

</bundles_post_ra>
